<compile_context>
chip_gen: v6e
topology: v6e:2x2x1
jax: 0.10.0
libtpu: 0.0.40
codegen_flags: <defaults>
</compile_context>

<pallas_src>
import math
import jax
import jax.numpy as jnp
from jax.experimental import pallas as pl
from jax.experimental.pallas import tpu as pltpu

# STATE_SPACE_SIZE / ACTION_SPACE_SIZE are undefined globals in the reference;
# pick small, consistent values for this synthetic kernel.
STATE_SPACE_SIZE = 8
HIDDEN_SPACE_SIZE = 24
ACTION_SPACE_SIZE = 4

LANES = 128          # lane-dense padded feature width for the hidden layers
NEG_BIG = -1e30      # bias for padded action columns -> exp() underflows to 0


def _round_up(n, m):
    return ((n + m - 1) // m) * m


def pge_kernel(x_ref, w1_ref, b1_ref, w2_ref, b2_ref, w3_ref, b3_ref, probs_ref):
    # bf16 MXU operands, f32 accumulation / VPU math.
    x = x_ref[...].astype(jnp.bfloat16)                                   # [Bt, S]

    # dense1 + relu  ([Bt,8] @ [8,128])
    h1 = jnp.dot(x, w1_ref[...], preferred_element_type=jnp.float32) + b1_ref[...]
    h1 = jnp.maximum(h1, 0.0)                                             # [Bt, 128] f32

    # dense2 + relu  ([Bt,128] @ [128,128]; padded rows/cols are zero)
    h2 = jnp.dot(h1.astype(jnp.bfloat16), w2_ref[...],
                 preferred_element_type=jnp.float32) + b2_ref[...]
    h2 = jnp.maximum(h2, 0.0)                                             # [Bt, 128] f32

    # dense3 -> lane-dense logits; padded action columns carry bias -1e30
    logits = jnp.dot(h2.astype(jnp.bfloat16), w3_ref[...],
                     preferred_element_type=jnp.float32) + b3_ref[...]    # [Bt, 128]

    # numerically-stable softmax over the (full 128-lane) action axis;
    # padded columns contribute exp(-1e30 - m) == 0 exactly.  Exact divide so
    # rows sum to 1 (downstream Categorical assumes normalized probs).
    m = jnp.max(logits, axis=-1, keepdims=True)
    e = jnp.exp(logits - m)
    denom = jnp.sum(e, axis=-1, keepdims=True)
    probs = e / denom                                                     # [Bt, 128]

    # Only the real action columns go back to HBM (block last dim == array dim).
    probs_ref[...] = probs[:, :ACTION_SPACE_SIZE].astype(probs_ref.dtype)


def pge_forward(x, padded_params, *, b_tile=4096):
    """x: [B, STATE_SPACE_SIZE] f32 -> probs: [B, ACTION_SPACE_SIZE] f32."""
    B, S = x.shape
    assert S == STATE_SPACE_SIZE

    # Clamp the tile to the (row-padded) batch; tiles are multiples of 8 sublanes.
    b_tile = _round_up(min(b_tile, _round_up(B, 8)), 8)
    n_tiles = pl.cdiv(B, b_tile)
    if n_tiles > 1 and n_tiles % 2 != 0:
        n_tiles += 1                     # even grid -> balanced 2-TC split on v7x
    Bp = n_tiles * b_tile
    if Bp != B:
        x = jnp.pad(x, ((0, Bp - B), (0, 0)))

    pp = padded_params
    rep = lambda i: (0, 0)   # weights/biases: same (only) block -> fetched once

    out = pl.pallas_call(
        pge_kernel,
        out_shape=jax.ShapeDtypeStruct((Bp, ACTION_SPACE_SIZE), jnp.float32),
        grid=(n_tiles,),
        in_specs=[
            pl.BlockSpec((b_tile, STATE_SPACE_SIZE), lambda i: (i, 0)),   # x (f32)
            pl.BlockSpec((STATE_SPACE_SIZE, LANES), rep),                 # w1 (bf16)
            pl.BlockSpec((1, LANES), rep),                                # b1 (f32)
            pl.BlockSpec((LANES, LANES), rep),                            # w2 (bf16)
            pl.BlockSpec((1, LANES), rep),                                # b2 (f32)
            pl.BlockSpec((LANES, LANES), rep),                            # w3 (bf16)
            pl.BlockSpec((1, LANES), rep),                                # b3 (f32)
        ],
        out_specs=pl.BlockSpec((b_tile, ACTION_SPACE_SIZE), lambda i: (i, 0)),
        compiler_params=pltpu.CompilerParams(
            dimension_semantics=("parallel",),        # shard batch grid on v7x's 2 TCs
            vmem_limit_bytes=32 * 1024 * 1024,        # explicit, v7x-safe budget
        ),
    )(x, pp["w1"], pp["b1"], pp["w2"], pp["b2"], pp["w3"], pp["b3"])

    return out[:B]


def init_params(key):
    """Deterministic init matching nn.Linear's default U(-1/sqrt(fan_in), 1/sqrt(fan_in)).

    Weights stored [in_features, out_features] (transposed vs torch) so each
    layer is a plain x @ W + b on the MXU; biases are [1, out] rows.
    """
    def linear(k, fan_in, fan_out):
        kw, kb = jax.random.split(k)
        bound = 1.0 / math.sqrt(fan_in)
        w = jax.random.uniform(kw, (fan_in, fan_out), jnp.float32, -bound, bound)
        b = jax.random.uniform(kb, (1, fan_out), jnp.float32, -bound, bound)
        return w, b

    k1, k2, k3 = jax.random.split(key, 3)
    w1, b1 = linear(k1, STATE_SPACE_SIZE, HIDDEN_SPACE_SIZE)
    w2, b2 = linear(k2, HIDDEN_SPACE_SIZE, HIDDEN_SPACE_SIZE)
    w3, b3 = linear(k3, HIDDEN_SPACE_SIZE, ACTION_SPACE_SIZE)
    return {"w1": w1, "b1": b1, "w2": w2, "b2": b2, "w3": w3, "b3": b3}


def pad_params(p):
    """One-time padding of weights/biases to lane-dense 128-wide layouts.

    Zero padding is numerically free for dot/ReLU/bias; padded action-logit
    columns get a -1e30 bias so the full-lane softmax ignores them exactly.
    Weights are stored bf16 (MXU operands); biases stay f32.
    """
    hp = LANES - HIDDEN_SPACE_SIZE
    ap = LANES - ACTION_SPACE_SIZE
    w1 = jnp.pad(p["w1"], ((0, 0), (0, hp))).astype(jnp.bfloat16)         # [8, 128]
    b1 = jnp.pad(p["b1"], ((0, 0), (0, hp)))                              # [1, 128] f32
    w2 = jnp.pad(p["w2"], ((0, hp), (0, hp))).astype(jnp.bfloat16)        # [128, 128]
    b2 = jnp.pad(p["b2"], ((0, 0), (0, hp)))                              # [1, 128] f32
    w3 = jnp.pad(p["w3"], ((0, hp), (0, ap))).astype(jnp.bfloat16)        # [128, 128]
    b3 = jnp.pad(p["b3"], ((0, 0), (0, ap)), constant_values=NEG_BIG)     # [1, 128] f32
    return {"w1": w1, "b1": b1, "w2": w2, "b2": b2, "w3": w3, "b3": b3}


def pge_forward_ref(x, p):
    """Pure-JAX f32 reference (unpadded params) for sanity checking."""
    h1 = jnp.maximum(x @ p["w1"] + p["b1"], 0.0)
    h2 = jnp.maximum(h1 @ p["w2"] + p["b2"], 0.0)
    logits = h2 @ p["w3"] + p["b3"]
    return jax.nn.softmax(logits, axis=-1)


if __name__ == "__main__":
    key = jax.random.PRNGKey(0)
    kx, kp = jax.random.split(key)

    params = init_params(kp)
    padded = pad_params(params)

    # Small demo batch that still exercises the batch grid: 4 tiles of 64 rows
    # (even grid step count -> balanced dual-TC split on v7x).
    batch = 256
    x = jax.random.normal(kx, (batch, STATE_SPACE_SIZE), jnp.float32)

    probs = jax.block_until_ready(pge_forward(x, padded, b_tile=64))
    ref = pge_forward_ref(x, params)

    assert probs.shape == (batch, ACTION_SPACE_SIZE)
    # Exact-divide softmax: rows sum to 1 to f32 rounding.
    assert jnp.allclose(jnp.sum(probs, axis=-1), 1.0, atol=1e-5)
    # bf16 MXU operands vs f32 reference -> loosened tolerance.
    assert jnp.allclose(probs, ref, atol=2e-2)

    # Ragged batch exercises the row-padding / slicing path (single tile).
    x2 = jax.random.normal(jax.random.PRNGKey(1), (10, STATE_SPACE_SIZE), jnp.float32)
    probs2 = jax.block_until_ready(pge_forward(x2, padded))
    ref2 = pge_forward_ref(x2, params)
    assert probs2.shape == (10, ACTION_SPACE_SIZE)
    assert jnp.allclose(jnp.sum(probs2, axis=-1), 1.0, atol=1e-5)
    assert jnp.allclose(probs2, ref2, atol=2e-2)

    print("KERNEL_OK")
</pallas_src>

<mosaic_0001>
module attributes {stable_mosaic.version = 11 : i64} {
  func.func @pge_kernel(%arg0: i32, %arg1: memref<64x8xf32, #tpu.memory_space<vmem>>, %arg2: memref<8x128xbf16, #tpu.memory_space<vmem>>, %arg3: memref<1x128xf32, #tpu.memory_space<vmem>>, %arg4: memref<128x128xbf16, #tpu.memory_space<vmem>>, %arg5: memref<1x128xf32, #tpu.memory_space<vmem>>, %arg6: memref<128x128xbf16, #tpu.memory_space<vmem>>, %arg7: memref<1x128xf32, #tpu.memory_space<vmem>>, %arg8: memref<64x4xf32, #tpu.memory_space<vmem>>) attributes {dimension_semantics = [#tpu.dimension_semantics<parallel>], iteration_bounds = array<i64: 4>, scalar_prefetch = 0 : i64, scratch_operands = 0 : i64, tpu.core_type = #tpu.core_type<tc>, window_params = [{transform_indices = @transform_0, window_bounds = array<i64: 64, 8>}, {pipeline_mode = #tpu.pipeline_mode<synchronous>, transform_indices = @transform_1, window_bounds = array<i64: 8, 128>}, {pipeline_mode = #tpu.pipeline_mode<synchronous>, transform_indices = @transform_2, window_bounds = array<i64: 1, 128>}, {pipeline_mode = #tpu.pipeline_mode<synchronous>, transform_indices = @transform_3, window_bounds = array<i64: 128, 128>}, {pipeline_mode = #tpu.pipeline_mode<synchronous>, transform_indices = @transform_4, window_bounds = array<i64: 1, 128>}, {pipeline_mode = #tpu.pipeline_mode<synchronous>, transform_indices = @transform_5, window_bounds = array<i64: 128, 128>}, {pipeline_mode = #tpu.pipeline_mode<synchronous>, transform_indices = @transform_6, window_bounds = array<i64: 1, 128>}, {transform_indices = @transform_7, window_bounds = array<i64: 64, 4>}]} {
    %c0 = arith.constant 0 : index
    %c0_0 = arith.constant 0 : index
    %0 = vector.load %arg1[%c0, %c0_0] : memref<64x8xf32, #tpu.memory_space<vmem>>, vector<64x8xf32>
    %1 = arith.truncf %0 : vector<64x8xf32> to vector<64x8xbf16>
    %c0_1 = arith.constant 0 : index
    %c0_2 = arith.constant 0 : index
    %2 = vector.load %arg2[%c0_1, %c0_2] : memref<8x128xbf16, #tpu.memory_space<vmem>>, vector<8x128xbf16>
    %cst = arith.constant dense<0.000000e+00> : vector<64x128xf32>
    %3 = tpu.matmul %1, %2, %cst {dimension_numbers = #tpu.dot_dimension_numbers<[1], [0], [0], [1], [0, 0, 1, 1], [], []>} : vector<64x8xbf16>, vector<8x128xbf16>, vector<64x128xf32> -> vector<64x128xf32>
    %c0_3 = arith.constant 0 : index
    %c0_4 = arith.constant 0 : index
    %4 = vector.load %arg3[%c0_3, %c0_4] : memref<1x128xf32, #tpu.memory_space<vmem>>, vector<1x128xf32>
    %5 = vector.broadcast %4 : vector<1x128xf32> to vector<64x128xf32>
    %6 = arith.addf %3, %5 : vector<64x128xf32>
    %cst_5 = arith.constant 0.000000e+00 : f32
    %7 = vector.broadcast %cst_5 : f32 to vector<64x128xf32>
    %8 = arith.maximumf %6, %7 : vector<64x128xf32>
    %9 = arith.truncf %8 : vector<64x128xf32> to vector<64x128xbf16>
    %c0_6 = arith.constant 0 : index
    %c0_7 = arith.constant 0 : index
    %10 = vector.load %arg4[%c0_6, %c0_7] : memref<128x128xbf16, #tpu.memory_space<vmem>>, vector<128x128xbf16>
    %cst_8 = arith.constant dense<0.000000e+00> : vector<64x128xf32>
    %11 = tpu.matmul %9, %10, %cst_8 {dimension_numbers = #tpu.dot_dimension_numbers<[1], [0], [0], [1], [0, 0, 1, 1], [], []>} : vector<64x128xbf16>, vector<128x128xbf16>, vector<64x128xf32> -> vector<64x128xf32>
    %c0_9 = arith.constant 0 : index
    %c0_10 = arith.constant 0 : index
    %12 = vector.load %arg5[%c0_9, %c0_10] : memref<1x128xf32, #tpu.memory_space<vmem>>, vector<1x128xf32>
    %13 = vector.broadcast %12 : vector<1x128xf32> to vector<64x128xf32>
    %14 = arith.addf %11, %13 : vector<64x128xf32>
    %cst_11 = arith.constant 0.000000e+00 : f32
    %15 = vector.broadcast %cst_11 : f32 to vector<64x128xf32>
    %16 = arith.maximumf %14, %15 : vector<64x128xf32>
    %17 = arith.truncf %16 : vector<64x128xf32> to vector<64x128xbf16>
    %c0_12 = arith.constant 0 : index
    %c0_13 = arith.constant 0 : index
    %18 = vector.load %arg6[%c0_12, %c0_13] : memref<128x128xbf16, #tpu.memory_space<vmem>>, vector<128x128xbf16>
    %cst_14 = arith.constant dense<0.000000e+00> : vector<64x128xf32>
    %19 = tpu.matmul %17, %18, %cst_14 {dimension_numbers = #tpu.dot_dimension_numbers<[1], [0], [0], [1], [0, 0, 1, 1], [], []>} : vector<64x128xbf16>, vector<128x128xbf16>, vector<64x128xf32> -> vector<64x128xf32>
    %c0_15 = arith.constant 0 : index
    %c0_16 = arith.constant 0 : index
    %20 = vector.load %arg7[%c0_15, %c0_16] : memref<1x128xf32, #tpu.memory_space<vmem>>, vector<1x128xf32>
    %21 = vector.broadcast %20 : vector<1x128xf32> to vector<64x128xf32>
    %22 = arith.addf %19, %21 : vector<64x128xf32>
    %cst_17 = arith.constant dense<0xFF800000> : vector<64xf32>
    %23 = vector.multi_reduction <maximumf>, %22, %cst_17 [1] : vector<64x128xf32> to vector<64xf32>
    %24 = vector.shape_cast %23 : vector<64xf32> to vector<64x1xf32>
    %25 = vector.broadcast %24 : vector<64x1xf32> to vector<64x128xf32>
    %26 = arith.subf %22, %25 : vector<64x128xf32>
    %27 = math.exp %26 : vector<64x128xf32>
    %cst_18 = arith.constant dense<0.000000e+00> : vector<64xf32>
    %28 = vector.multi_reduction <add>, %27, %cst_18 [1] : vector<64x128xf32> to vector<64xf32>
    %29 = vector.shape_cast %28 : vector<64xf32> to vector<64x1xf32>
    %30 = vector.broadcast %29 : vector<64x1xf32> to vector<64x128xf32>
    %31 = arith.divf %27, %30 : vector<64x128xf32>
    %32 = vector.extract_strided_slice %31 {offsets = [0, 0], sizes = [64, 4], strides = [1, 1]} : vector<64x128xf32> to vector<64x4xf32>
    %c0_19 = arith.constant 0 : index
    %c0_20 = arith.constant 0 : index
    %33 = vector.load %arg8[%c0_19, %c0_20] : memref<64x4xf32, #tpu.memory_space<vmem>>, vector<64x4xf32>
    tpu.vector_store %arg8[%c0_19, %c0_20], %32 {strides = array<i32>} : memref<64x4xf32, #tpu.memory_space<vmem>>, vector<64x4xf32>,
    return
  }
  func.func @transform_0(%arg0: i32) -> (i32, i32) {
    %c0_i32 = arith.constant 0 : i32
    %c0_i32_0 = arith.constant 0 : i32
    return %arg0, %c0_i32 : i32, i32
  }
  func.func @transform_1(%arg0: i32) -> (i32, i32) {
    %c0_i32 = arith.constant 0 : i32
    %c0_i32_0 = arith.constant 0 : i32
    %c0_i32_1 = arith.constant 0 : i32
    return %c0_i32, %c0_i32_0 : i32, i32
  }
  func.func @transform_2(%arg0: i32) -> (i32, i32) {
    %c0_i32 = arith.constant 0 : i32
    %c0_i32_0 = arith.constant 0 : i32
    %c0_i32_1 = arith.constant 0 : i32
    return %c0_i32, %c0_i32_0 : i32, i32
  }
  func.func @transform_3(%arg0: i32) -> (i32, i32) {
    %c0_i32 = arith.constant 0 : i32
    %c0_i32_0 = arith.constant 0 : i32
    %c0_i32_1 = arith.constant 0 : i32
    return %c0_i32, %c0_i32_0 : i32, i32
  }
  func.func @transform_4(%arg0: i32) -> (i32, i32) {
    %c0_i32 = arith.constant 0 : i32
    %c0_i32_0 = arith.constant 0 : i32
    %c0_i32_1 = arith.constant 0 : i32
    return %c0_i32, %c0_i32_0 : i32, i32
  }
  func.func @transform_5(%arg0: i32) -> (i32, i32) {
    %c0_i32 = arith.constant 0 : i32
    %c0_i32_0 = arith.constant 0 : i32
    %c0_i32_1 = arith.constant 0 : i32
    return %c0_i32, %c0_i32_0 : i32, i32
  }
  func.func @transform_6(%arg0: i32) -> (i32, i32) {
    %c0_i32 = arith.constant 0 : i32
    %c0_i32_0 = arith.constant 0 : i32
    %c0_i32_1 = arith.constant 0 : i32
    return %c0_i32, %c0_i32_0 : i32, i32
  }
  func.func @transform_7(%arg0: i32) -> (i32, i32) {
    %c0_i32 = arith.constant 0 : i32
    %c0_i32_0 = arith.constant 0 : i32
    return %arg0, %c0_i32 : i32, i32
  }
}

</mosaic_0001>

<bundles_post_ra>
// kernel: tpu_custom_call.1
= control target key start
LH: loop header
LB: loop body
LE: loop exit
PB: predicated region body
PF: predicated region fallthrough
CT: control target
= control target key end

     0   :  { %s1044_s24 = smov 0   ;;  %s1140_s0 = inlined_call_operand.vmem [shape: f32[256,8], index: 0, kind: input, shape index: {}]   ;;  %s1141_s1 = inlined_call_operand.vmem [shape: bf16[8,128], index: 1, kind: input, shape index: {}]   ;;  %s1142_s2 = inlined_call_operand.vmem [shape: f32[1,128], index: 2, kind: input, shape index: {}]   ;;  %s1143_s3 = inlined_call_operand.vmem [shape: bf16[128,128], index: 3, kind: input, shape index: {}]   ;;  %s1144_s4 = inlined_call_operand.vmem [shape: f32[1,128], index: 4, kind: input, shape index: {}]   ;;  %s1145_s5 = inlined_call_operand.vmem [shape: bf16[128,128], index: 5, kind: input, shape index: {}]   ;;  %s1146_s6 = inlined_call_operand.vmem [shape: f32[1,128], index: 6, kind: input, shape index: {}]   ;;  %s1147_s7 = inlined_call_operand.vmem [shape: f32[256,4], index: 7, kind: output, shape index: {}]  }
   0x1 LB: > { %s818_s25 = sadd.s32 4294967295, %s1002_s24   ;;  %p822_p0 = scmp.ge.s32.totalorder %s1002_s24, 1  ;;  %s1002_s24 = sphi %s1044_s24, %s17_s24  }
   0x2   : > { %p238_p1 = scmp.lt.s32.totalorder %s1002_s24, 5 }
   0x4   : > { %p239_p2 = pnand %p822_p0, %p238_p1 }
   0x5   : > { %s823_s28 = sshll.u32 (!%p239_p2), %s818_s25, 3 }
   0x6   : > { %242 = sbr.rel (%p239_p2) target bundleno = 954 (0x3ba), region = 48  ;;  %p271_p3 = scmp.lt.s32.totalorder (!%p239_p2), %s823_s28, 31 }
   0xb   : > { %v295_v0 = vld [vmem:[%s1141_s1] sm:$0xf]  ;;  %vm316_vm0 = vcmask 1043456   ;;  %v948_v1 = vld [vmem:[%s1143_s3 + $0x38] sm:$0xff]   ;;  %v949_v3 = vld [vmem:[%s1143_s3 + $0x30] sm:$0xff]   ;;  %s1149_s28 = smov (!%p271_p3, %s823_s28), 31 }
   0xc   : > { %939 = vmatprep.subr.msk.bf16.mxu0 %vm316_vm0, %v295_v0  ;;  %v318_v2 = vsel %vm316_vm0, %v295_v0, 0  ;;  %891 = vmatprep.subr.bf16.mxu1 %v948_v1  ;;  %v950_v4 = vld [vmem:[%s1143_s3 + $0x28] sm:$0xff]   ;;  %s824_s12 = sshll.u32 %s1149_s28, 3  ;;  %v951_v5 = vld [vmem:[%s1143_s3 + $0x20] sm:$0xff]   ;;  %vm303_vm1 = vcmask 64512   ;;  %v952_v17 = vld [vmem:[%s1143_s3 + $0x18] sm:$0xff]  }
   0xd   : > { %882 = vmatpush3.bf16.msra.mxu0 %v318_v2  ;;  %892 = vmatpush3.bf16.msra.mxu1 %v948_v1  ;;  %s274_s15 = scalar_lea.vmem %s1140_s0, %s824_s12  ;;  %v953_v19 = vld [vmem:[%s1143_s3 + $0x10] sm:$0xff]   ;;  %v954_v20 = vld [vmem:[%s1143_s3 + $0x8] sm:$0xff]   ;;  %v955_v21 = vld [vmem:[%s1143_s3] sm:$0xff]   ;;  %s280_s9 = scalar_lea.vmem %s1147_s7, %s824_s12  ;;  %vm753_vm2 = vcmask 31744  }
   0xe   : > { %893 = vmatprep.subr.bf16.mxu1 %v949_v3  ;;  %v283_v6 = vld [vmem:[%s274_s15] sm:$0xff]  ;;  %v284_v7 = vld [vmem:[%s274_s15 + $0x8] sm:$0xff]  ;;  %v285_v8 = vld [vmem:[%s274_s15 + $0x10] sm:$0xff] }
   0xf   : > { %v291_v9 = vpack.c.bf16 %v284_v7, %v283_v6  ;;  %v286_v10 = vld [vmem:[%s274_s15 + $0x18] sm:$0xff]  ;;  %v287_v11 = vld [vmem:[%s274_s15 + $0x20] sm:$0xff]  ;;  %v288_v12 = vld [vmem:[%s274_s15 + $0x28] sm:$0xff] }
  0x10   : > { %v292_v13 = vpack.c.bf16 %v286_v10, %v285_v8  ;;  %v293_v14 = vpack.c.bf16 %v288_v12, %v287_v11  ;;  %v289_v15 = vld [vmem:[%s274_s15 + $0x30] sm:$0xff]  ;;  %v290_v16 = vld [vmem:[%s274_s15 + $0x38] sm:$0xff]  ;;  %v958_v24 = vld [vmem:[%s1145_s5 + $0x28] sm:$0xff]  }
  0x11   : > { %894 = vmatpush3.bf16.msra.mxu1 %v949_v3  ;;  %883 = vmatprep.mubr.msk.bf16.mxu0 %vm303_vm1, %v291_v9  ;;  %v294_v18 = vpack.c.bf16 %v290_v16, %v289_v15  ;;  %v956_v22 = vld [vmem:[%s1145_s5 + $0x38] sm:$0xff]   ;;  %v957_v23 = vld [vmem:[%s1145_s5 + $0x30] sm:$0xff]   ;;  %v959_v25 = vld [vmem:[%s1145_s5 + $0x20] sm:$0xff]  }
  0x12   : > { %895 = vmatprep.subr.bf16.mxu1 %v950_v4  ;;  %884 = vmatmul.mubr.msk.bf16.vlgmr.msra.gmra.mxu0 %vm303_vm1, %v292_v13  ;;  %v960_v26 = vld [vmem:[%s1145_s5 + $0x18] sm:$0xff]   ;;  %v827_v29 = vld [vmem:[%s1142_s2] ss:$0 sm:$0xff]  ;;  %v961_v56 = vld [vmem:[%s1145_s5 + $0x10] sm:$0xff]  }
  0x13   : > { %887 = vmatprep.mubr.msk.bf16.mxu0 %vm303_vm1, %v293_v14  ;;  %915 = vmatprep.subr.bf16.mxu0 %v956_v22  ;;  %v962_v57 = vld [vmem:[%s1145_s5 + $0x8] sm:$0xff]   ;;  %v963_v58 = vld [vmem:[%s1145_s5] sm:$0xff]  }
  0x14   : > { %916 = vmatpush3.bf16.msra.mxu0 %v956_v22  ;;  %v832_v61 = vld [vmem:[%s1144_s4] ss:$0 sm:$0xff] }
  0x15   : > { %896 = vmatpush3.bf16.msra.mxu1 %v950_v4  ;;  %917 = vmatprep.subr.bf16.mxu0 %v957_v23 }
  0x16   : > { %897 = vmatprep.subr.bf16.mxu1 %v951_v5 }
  0x18   : > { %918 = vmatpush3.bf16.msra.mxu0 %v957_v23 }
  0x19   : > { %898 = vmatpush3.bf16.msra.mxu1 %v951_v5  ;;  %919 = vmatprep.subr.bf16.mxu0 %v958_v24 }
  0x1a   : > { %899 = vmatprep.subr.bf16.mxu1 %v952_v17  ;;  %888 = vmatmul.mubr.msk.bf16.gmra.mxu0 %vm303_vm1, %v294_v18 }
  0x1c   : > { %920 = vmatpush3.bf16.msra.mxu0 %v958_v24  ;;  %v841_v24 = vld [vmem:[%s1146_s6] ss:$0 sm:$0xff] }
  0x1d   : > { %900 = vmatpush3.bf16.msra.mxu1 %v952_v17  ;;  %921 = vmatprep.subr.bf16.mxu0 %v959_v25 }
  0x1e   : > { %901 = vmatprep.subr.bf16.mxu1 %v953_v19 }
  0x20   : > { %922 = vmatpush3.bf16.msra.mxu0 %v959_v25 }
  0x21   : > { %902 = vmatpush3.bf16.msra.mxu1 %v953_v19  ;;  %923 = vmatprep.subr.bf16.mxu0 %v960_v26 }
  0x22   : > { %903 = vmatprep.subr.bf16.mxu1 %v954_v20 }
  0x24   : > { %924 = vmatpush3.bf16.msra.mxu0 %v960_v26 }
  0x25   : > { %904 = vmatpush3.bf16.msra.mxu1 %v954_v20  ;;  %925 = vmatprep.subr.bf16.mxu0 %v961_v56 }
  0x26   : > { %905 = vmatprep.subr.bf16.mxu1 %v955_v21 }
  0x28   : > { %926 = vmatpush3.bf16.msra.mxu0 %v961_v56 }
  0x29   : > { %906 = vmatpush3.bf16.msra.mxu1 %v955_v21  ;;  %927 = vmatprep.subr.bf16.mxu0 %v962_v57 }
  0x2c   : > { %928 = vmatpush3.bf16.msra.mxu0 %v962_v57 }
  0x2d   : > { %929 = vmatprep.subr.bf16.mxu0 %v963_v58 }
  0x30   : > { %930 = vmatpush3.bf16.msra.mxu0 %v963_v58 }
  0xd2   : > { %v885_v27 = vpop.f32.mrf.mxu0 }
  0xd3   : > { %v363_v33 = vadd.f32 %v885_v27, %v827_v29 }
  0xd4   : > { %v354_v28 = vpop.f32.mrf.mxu0 }
  0xd5   : > { %v355_v31 = vadd.f32 %v827_v29, %v354_v28  ;;  %v387_v40 = vmax.f32 %v363_v33, 0.0 }
  0xd6   : > { %v886_v30 = vpop.f32.mrf.mxu0 }
  0xd7   : > { %v366_v32 = vadd.f32 %v886_v30, %v827_v29  ;;  %v385_v38 = vmax.f32 %v355_v31, 0.0 }
  0xd8   : > { %v357_v34 = vpop.f32.mrf.mxu0 }
  0xd9   : > { %v358_v35 = vadd.f32 %v827_v29, %v357_v34  ;;  %v388_v36 = vmax.f32 %v366_v32, 0.0 }
  0xda   : > { %v889_v37 = vpop.f32.mrf.mxu0 }
  0xdb   : > { %v386_v39 = vmax.f32 %v358_v35, 0.0  ;;  %v394_v43 = vpack.c.bf16 %v388_v36, %v387_v40  ;;  %v379_v47 = vadd.f32 %v889_v37, %v827_v29 }
  0xdc   : > { %v370_v41 = vpop.f32.mrf.mxu0 }
  0xdd   : > { %v393_v42 = vpack.c.bf16 %v386_v39, %v385_v38  ;;  %v371_v45 = vadd.f32 %v827_v29, %v370_v41  ;;  %v391_v53 = vmax.f32 %v379_v47, 0.0 }
  0xde   : > { %v890_v44 = vpop.f32.mrf.mxu0 }
  0xdf   : > { %v382_v46 = vadd.f32 %v890_v44, %v827_v29  ;;  %907 = vmatprep.mubr.bf16.mxu1 %v393_v42  ;;  %v389_v51 = vmax.f32 %v371_v45, 0.0 }
  0xe0   : > { %v373_v48 = vpop.f32.mrf.mxu0  ;;  %908 = vmatmul.mubr.bf16.vlgmr.msra.gmra.mxu1 %v394_v43 }
  0xe1   : > { %v374_v49 = vadd.f32 %v827_v29, %v373_v48  ;;  %v392_v50 = vmax.f32 %v382_v46, 0.0 }
  0xe3   : > { %v390_v52 = vmax.f32 %v374_v49, 0.0  ;;  %v396_v55 = vpack.c.bf16 %v392_v50, %v391_v53 }
  0xe5   : > { %v395_v54 = vpack.c.bf16 %v390_v52, %v389_v51 }
  0xe7   : > { %911 = vmatprep.mubr.bf16.mxu1 %v395_v54 }
  0xe8   : > { %912 = vmatmul.mubr.bf16.gmra.mxu1 %v396_v55 }
 0x1a0   : > { %v909_v59 = vpop.f32.mrf.mxu1 }
 0x1a1   : > { %v511_v1 = vadd.f32 %v909_v59, %v832_v61 }
 0x1a2   : > { %v502_v60 = vpop.f32.mrf.mxu1 }
 0x1a3   : > { %v503_v63 = vadd.f32 %v832_v61, %v502_v60  ;;  %v535_v8 = vmax.f32 %v511_v1, 0.0 }
 0x1a4   : > { %v910_v62 = vpop.f32.mrf.mxu1 }
 0x1a5   : > { %v514_v0 = vadd.f32 %v910_v62, %v832_v61  ;;  %v533_v6 = vmax.f32 %v503_v63, 0.0 }
 0x1a6   : > { %v505_v2 = vpop.f32.mrf.mxu1 }
 0x1a7   : > { %v506_v3 = vadd.f32 %v832_v61, %v505_v2  ;;  %v536_v4 = vmax.f32 %v514_v0, 0.0 }
 0x1a8   : > { %v913_v5 = vpop.f32.mrf.mxu1 }
 0x1a9   : > { %v534_v7 = vmax.f32 %v506_v3, 0.0  ;;  %v542_v11 = vpack.c.bf16 %v536_v4, %v535_v8  ;;  %v527_v15 = vadd.f32 %v913_v5, %v832_v61 }
 0x1aa   : > { %v518_v9 = vpop.f32.mrf.mxu1 }
 0x1ab   : > { %v541_v10 = vpack.c.bf16 %v534_v7, %v533_v6  ;;  %v519_v13 = vadd.f32 %v832_v61, %v518_v9  ;;  %v539_v21 = vmax.f32 %v527_v15, 0.0 }
 0x1ac   : > { %v914_v12 = vpop.f32.mrf.mxu1 }
 0x1ad   : > { %v530_v14 = vadd.f32 %v914_v12, %v832_v61  ;;  %931 = vmatprep.mubr.bf16.mxu0 %v541_v10  ;;  %v537_v19 = vmax.f32 %v519_v13, 0.0 }
 0x1ae   : > { %v521_v16 = vpop.f32.mrf.mxu1  ;;  %932 = vmatmul.mubr.bf16.vlgmr.msra.gmra.mxu0 %v542_v11 }
 0x1af   : > { %v522_v17 = vadd.f32 %v832_v61, %v521_v16  ;;  %v540_v18 = vmax.f32 %v530_v14, 0.0 }
 0x1b1   : > { %v538_v20 = vmax.f32 %v522_v17, 0.0  ;;  %v544_v23 = vpack.c.bf16 %v540_v18, %v539_v21 }
 0x1b3   : > { %v543_v22 = vpack.c.bf16 %v538_v20, %v537_v19 }
 0x1b5   : > { %935 = vmatprep.mubr.bf16.mxu0 %v543_v22 }
 0x1b6   : > { %936 = vmatmul.mubr.bf16.gmra.mxu0 %v544_v23 }
 0x26e   : > { %v933_v25 = vpop.f32.mrf.mxu0 }
 0x26f   : > { %v659_v26 = vadd.f32 %v933_v25, %v841_v24 }
 0x270   : > { %v650_v27 = vpop.f32.mrf.mxu0 }
 0x271   : > { %v651_v28 = vadd.f32 %v841_v24, %v650_v27  ;;  %685 = vmax.xlane.f32.xlu1 %v659_v26 }
 0x272   : > { %v934_v29 = vpop.f32.mrf.mxu0 }
 0x273   : > { %v662_v30 = vadd.f32 %v934_v29, %v841_v24  ;;  %681 = vmax.xlane.f32.xlu0 %v651_v28 }
 0x274   : > { %v653_v31 = vpop.f32.mrf.mxu0 }
 0x275   : > { %v654_v32 = vadd.f32 %v841_v24, %v653_v31  ;;  %687 = vmax.xlane.f32.xlu1 %v662_v30 }
 0x276   : > { %v937_v33 = vpop.f32.mrf.mxu0 }
 0x277   : > { %683 = vmax.xlane.f32.xlu0 %v654_v32  ;;  %v675_v38 = vadd.f32 %v937_v33, %v841_v24 }
 0x278   : > { %v666_v34 = vpop.f32.mrf.mxu0 }
 0x279   : > { %v667_v35 = vadd.f32 %v841_v24, %v666_v34 }
 0x27a   : > { %v938_v36 = vpop.f32.mrf.mxu0 }
 0x27b   : > { %689 = vmax.xlane.f32.xlu0 %v667_v35  ;;  %v678_v40 = vadd.f32 %v938_v36, %v841_v24 }
 0x27c   : > { %v669_v37 = vpop.f32.mrf.mxu0 }
 0x27d   : > { %v670_v39 = vadd.f32 %v841_v24, %v669_v37 }
 0x27f   : > { %691 = vmax.xlane.f32.xlu1 %v670_v39  ;;  %693 = vmax.xlane.f32.xlu0 %v675_v38 }
 0x283   : > { %695 = vmax.xlane.f32.xlu1 %v678_v40 }
 0x2fa   : > { %v686_v41 = vpop.xlane.xlu1 %685 }
 0x2fb   : > { %v699_v42 = vsub.f32 %v659_v26, %v686_v41 }
 0x2fc   : > { %v682_v43 = vpop.xlane.xlu0 %681 }
 0x2fd   : > { %v709_v44 = vmul.f32 1.442695, %v699_v42  ;;  %v697_v45 = vsub.f32 %v651_v28, %v682_v43 }
 0x2fe   : > { %v688_v46 = vpop.xlane.xlu1 %687 }
 0x2ff   : > { %964 = vpow2.f32 %v709_v44  ;;  %v705_v47 = vmul.f32 1.442695, %v697_v45  ;;  %v700_v48 = vsub.f32 %v662_v30, %v688_v46 }
 0x300   : > { %v684_v49 = vpop.xlane.xlu0 %683 }
 0x301   : > { %v711_v50 = vmul.f32 1.442695, %v700_v48  ;;  %v698_v51 = vsub.f32 %v654_v32, %v684_v49  ;;  %966 = vpow2.f32 %v705_v47 }
 0x303   : > { %968 = vpow2.f32 %v711_v50  ;;  %v707_v52 = vmul.f32 1.442695, %v698_v51 }
 0x304   : > { %v690_v53 = vpop.xlane.xlu0 %689 }
 0x305   : > { %v701_v54 = vsub.f32 %v667_v35, %v690_v53  ;;  %970 = vpow2.f32 %v707_v52 }
 0x307   : > { %v713_v55 = vmul.f32 1.442695, %v701_v54 }
 0x308   : > { %v692_v56 = vpop.xlane.xlu1 %691  ;;  %v694_v57 = vpop.xlane.xlu0 %693 }
 0x309   : > { %972 = vpow2.f32 %v713_v55  ;;  %v702_v58 = vsub.f32 %v670_v39, %v692_v56  ;;  %v703_v59 = vsub.f32 %v675_v38, %v694_v57 }
 0x30b   : > { %v715_v60 = vmul.f32 1.442695, %v702_v58  ;;  %v717_v61 = vmul.f32 1.442695, %v703_v59 }
 0x30c   : > { %v965_v62 = vpop.eup %964  ;;  %v696_v63 = vpop.xlane.xlu1 %695 }
 0x30d   : > { %974 = vpow2.f32 %v715_v60  ;;  %v704_v0 = vsub.f32 %v678_v40, %v696_v63  ;;  %725 = vadd.xlane.f32.xlu0 %v965_v62 }
 0x30e   : > { %976 = vpow2.f32 %v717_v61  ;;  %v967_v1 = vpop.eup %966 }
 0x30f   : > { %v719_v2 = vmul.f32 1.442695, %v704_v0 }
 0x310   : > { %v969_v3 = vpop.eup %968 }
 0x311   : > { %978 = vpow2.f32 %v719_v2  ;;  %727 = vadd.xlane.f32.xlu1 %v969_v3  ;;  %721 = vadd.xlane.f32.xlu0 %v967_v1 }
 0x312   : > { %v971_v4 = vpop.eup %970 }
 0x315   : > { %723 = vadd.xlane.f32.xlu1 %v971_v4 }
 0x316   : > { %v973_v5 = vpop.eup %972 }
 0x317   : > { %729 = vadd.xlane.f32.xlu0 %v973_v5 }
 0x31a   : > { %v975_v6 = vpop.eup %974 }
 0x31b   : > { %v977_v7 = vpop.eup %976  ;;  %731 = vadd.xlane.f32.xlu1 %v975_v6 }
 0x31c   : > { %733 = vadd.xlane.f32.xlu0 %v977_v7 }
 0x31e   : > { %v979_v8 = vpop.eup %978 }
 0x31f   : > { %735 = vadd.xlane.f32.xlu1 %v979_v8 }
 0x396   : > { %v726_v9 = vpop.xlane.xlu0 %725 }
 0x397   : > { %980 = vrcp.f32 %v726_v9 }
 0x39a   : > { %v728_v10 = vpop.xlane.xlu1 %727  ;;  %v722_v11 = vpop.xlane.xlu0 %721 }
 0x39b   : > { %982 = vrcp.f32 %v728_v10 }
 0x39c   : > { %984 = vrcp.f32 %v722_v11 }
 0x39e   : > { %v724_v12 = vpop.xlane.xlu1 %723 }
 0x39f   : > { %986 = vrcp.f32 %v724_v12 }
 0x3a0   : > { %v730_v13 = vpop.xlane.xlu0 %729 }
 0x3a1   : > { %988 = vrcp.f32 %v730_v13 }
 0x3a4   : > { %v981_v14 = vpop.eup %980  ;;  %v732_v15 = vpop.xlane.xlu1 %731 }
 0x3a5   : > { %v742_v16 = vmul.f32 %v981_v14, %v965_v62  ;;  %990 = vrcp.f32 %v732_v15  ;;  %v734_v17 = vpop.xlane.xlu0 %733 }
 0x3a6   : > { %992 = vrcp.f32 %v734_v17 }
 0x3a7   : > { %756 = vst.msk [vmem:[%s280_s9 + $0x10] sm:$0xff] %vm753_vm2, %v742_v16 }
 0x3a8   : > { %v983_v18 = vpop.eup %982  ;;  %v736_v19 = vpop.xlane.xlu1 %735 }
 0x3a9   : > { %v985_v20 = vpop.eup %984  ;;  %v744_v21 = vmul.f32 %v983_v18, %v969_v3  ;;  %994 = vrcp.f32 %v736_v19 }
 0x3aa   : > { %v738_v22 = vmul.f32 %v985_v20, %v967_v1 }
 0x3ab   : > { %757 = vst.msk [vmem:[%s280_s9 + $0x18] sm:$0xff] %vm753_vm2, %v744_v21 }
 0x3ac   : > { %v987_v23 = vpop.eup %986  ;;  %754 = vst.msk [vmem:[%s280_s9] sm:$0xff] %vm753_vm2, %v738_v22 }
 0x3ad   : > { %v740_v24 = vmul.f32 %v987_v23, %v971_v4 }
 0x3ae   : > { %v989_v25 = vpop.eup %988 }
 0x3af   : > { %755 = vst.msk [vmem:[%s280_s9 + $0x8] sm:$0xff] %vm753_vm2, %v740_v24  ;;  %v746_v26 = vmul.f32 %v989_v25, %v973_v5 }
 0x3b1   : > { %758 = vst.msk [vmem:[%s280_s9 + $0x20] sm:$0xff] %vm753_vm2, %v746_v26 }
 0x3b2   : > { %v991_v27 = vpop.eup %990 }
 0x3b3   : > { %v993_v28 = vpop.eup %992  ;;  %v748_v29 = vmul.f32 %v991_v27, %v975_v6 }
 0x3b4   : > { %v750_v30 = vmul.f32 %v993_v28, %v977_v7 }
 0x3b5   : > { %759 = vst.msk [vmem:[%s280_s9 + $0x28] sm:$0xff] %vm753_vm2, %v748_v29 }
 0x3b6   : > { %v995_v31 = vpop.eup %994  ;;  %760 = vst.msk [vmem:[%s280_s9 + $0x30] sm:$0xff] %vm753_vm2, %v750_v30 }
 0x3b7   : > { %v752_v32 = vmul.f32 %v995_v31, %v979_v8 }
 0x3b9   : > { %761 = vst.msk [vmem:[%s280_s9 + $0x38] sm:$0xff] %vm753_vm2, %v752_v32 }
 0x3ba PF: > { %s17_s24 = sadd.s32 1, %s1002_s24  }
 0x3bb   : > { %p14_p4 = scmp.ge.s32.totalorder %s17_s24, 6  }
 0x3bd   :  { %16 = sbr.rel (!%p14_p4) target bundleno = 1 (0x1), region = 78 }

</bundles_post_ra>
